<compile_context>
chip_gen: v7x
topology: tpu7x:2x2x1
jax: 0.10.0
libtpu: 0.0.40
codegen_flags: <defaults>
</compile_context>

<pallas_src>
import jax
import jax.numpy as jnp
from jax.experimental import pallas as pl
from jax.experimental.pallas import tpu as pltpu


def ddqn_kernel(x_ref, w1_ref, b1_ref, w2_ref, b2_ref, w3_ref, b3_ref, o_ref):
    # x: (S, TB) bf16, weights (out, in) bf16, biases (out, 1) f32.
    # All intermediates are (feat, TB): batch on the lane axis -> dense vregs
    # and unmasked full-width stores.
    x = x_ref[...]

    # head_1 + ReLU : (L, S) @ (S, TB) -> (L, TB)
    h1 = jnp.dot(w1_ref[...], x, preferred_element_type=jnp.float32)
    h1 = jnp.maximum(h1 + b1_ref[...], 0.0)

    # ff_1 + ReLU : (L, L) @ (L, TB) -> (L, TB)
    h2 = jnp.dot(w2_ref[...], h1.astype(w2_ref.dtype),
                 preferred_element_type=jnp.float32)
    h2 = jnp.maximum(h2 + b2_ref[...], 0.0)

    # ff_2 (no activation) : (A, L) @ (L, TB) -> (A, TB)
    out = jnp.dot(w3_ref[...], h2.astype(w3_ref.dtype),
                  preferred_element_type=jnp.float32)
    o_ref[...] = (out + b3_ref[...]).astype(o_ref.dtype)


def _round_up(n, m):
    return ((n + m - 1) // m) * m


def prepare_params(params):
    """One-time layout/dtype conversion (outside the per-step forward path).

    Weights stay in torch (out, in) layout as bf16 (the kernel computes
    W @ x); biases become (out, 1) f32 columns that broadcast over the
    lane (batch) axis.
    """
    return {
        "w1": jnp.asarray(params["head_1.weight"]).astype(jnp.bfloat16),
        "b1": jnp.asarray(params["head_1.bias"])[:, None].astype(jnp.float32),
        "w2": jnp.asarray(params["ff_1.weight"]).astype(jnp.bfloat16),
        "b2": jnp.asarray(params["ff_1.bias"])[:, None].astype(jnp.float32),
        "w3": jnp.asarray(params["ff_2.weight"]).astype(jnp.bfloat16),
        "b3": jnp.asarray(params["ff_2.bias"])[:, None].astype(jnp.float32),
    }


# Max batch-tile width (lane axis).  Chosen so per-grid-step overhead is
# amortized; VMEM usage at this size is still only a few MiB (double-buffered
# x tile 512 KiB, out tile 256 KiB, intermediates ~2 MiB), far below every
# generation's scoped VMEM limit.
_TB_MAX = 8192
_LANE = 128


def _pick_tiling(B):
    """Return (tb, b_pad, n_steps) for a batch of B rows."""
    if B <= _TB_MAX:
        tb = _round_up(max(B, 1), _LANE)
        return tb, tb, 1
    n_steps = -(-B // _TB_MAX)          # cdiv
    if n_steps % 2:
        n_steps += 1                    # even split across v7x's 2 TCs (no-op on v5e/v6e)
    tb = _round_up(-(-B // n_steps), _LANE)
    return tb, n_steps * tb, n_steps


@jax.jit
def ddqn_forward(x, prep):
    """x: (B, state_size) float32; prep: output of prepare_params()."""
    B, S = x.shape
    L = prep["w1"].shape[0]
    A = prep["w3"].shape[0]

    tb, b_pad, n_steps = _pick_tiling(B)

    # Batch onto the lane axis: (B, S) -> (S, B_pad) bf16.
    x_t = x.T
    if b_pad != B:
        x_t = jnp.pad(x_t, ((0, 0), (0, b_pad - B)))
    x_t = x_t.astype(jnp.bfloat16)

    out = pl.pallas_call(
        ddqn_kernel,
        out_shape=jax.ShapeDtypeStruct((A, b_pad), jnp.float32),
        grid=(n_steps,),
        in_specs=[
            # batch-tiled activations (batch on lane axis)
            pl.BlockSpec((S, tb), lambda i: (0, i)),
            # weights / biases: same block every step -> VMEM-resident
            pl.BlockSpec((L, S), lambda i: (0, 0)),
            pl.BlockSpec((L, 1), lambda i: (0, 0)),
            pl.BlockSpec((L, L), lambda i: (0, 0)),
            pl.BlockSpec((L, 1), lambda i: (0, 0)),
            pl.BlockSpec((A, L), lambda i: (0, 0)),
            pl.BlockSpec((A, 1), lambda i: (0, 0)),
        ],
        out_specs=pl.BlockSpec((A, tb), lambda i: (0, i)),
        compiler_params=pltpu.CompilerParams(
            dimension_semantics=("parallel",)),
    )(x_t, prep["w1"], prep["b1"], prep["w2"], prep["b2"],
      prep["w3"], prep["b3"])

    # (A, b_pad) -> (B, A)
    return out[:, :B].T


def init_params(key, state_size, action_size, layer_size):
    """Deterministic init mimicking torch.nn.Linear defaults: U(+-1/sqrt(fan_in))."""
    def linear_init(k, fan_in, fan_out):
        kw, kb = jax.random.split(k)
        bound = 1.0 / jnp.sqrt(fan_in)
        w = jax.random.uniform(kw, (fan_out, fan_in), jnp.float32, -bound, bound)
        b = jax.random.uniform(kb, (fan_out,), jnp.float32, -bound, bound)
        return w, b

    k1, k2, k3 = jax.random.split(key, 3)
    w1, b1 = linear_init(k1, state_size, layer_size)
    w2, b2 = linear_init(k2, layer_size, layer_size)
    w3, b3 = linear_init(k3, layer_size, action_size)
    return {
        "head_1.weight": w1, "head_1.bias": b1,
        "ff_1.weight": w2, "ff_1.bias": b2,
        "ff_2.weight": w3, "ff_2.bias": b3,
    }


def ddqn_reference(x, p):
    h1 = jnp.maximum(x @ p["head_1.weight"].T + p["head_1.bias"], 0.0)
    h2 = jnp.maximum(h1 @ p["ff_1.weight"].T + p["ff_1.bias"], 0.0)
    return h2 @ p["ff_2.weight"].T + p["ff_2.bias"]


if __name__ == "__main__":
    state_size, action_size, layer_size = 16, 4, 32

    key = jax.random.PRNGKey(0)
    kx, kx2, kx3, kp = jax.random.split(key, 4)
    params = init_params(kp, state_size, action_size, layer_size)
    prep = prepare_params(params)   # one-time layout/dtype conversion

    # bf16 inputs/weights -> loosened tolerance vs. f32 reference.
    ATOL, RTOL = 2e-2, 2e-2

    # Small inference-style batch (single tile, grid=(1,)).
    batch = 8
    x = jax.random.normal(kx, (batch, state_size), jnp.float32)
    out = jax.block_until_ready(ddqn_forward(x, prep))
    ref = ddqn_reference(x, params)
    assert out.shape == (batch, action_size)
    assert jnp.allclose(out, ref, atol=ATOL, rtol=RTOL), "mismatch (batch=8)"

    # Training-style batch that needs lane padding (still a single tile).
    batch2 = 300
    x2 = jax.random.normal(kx2, (batch2, state_size), jnp.float32)
    out2 = jax.block_until_ready(ddqn_forward(x2, prep))
    ref2 = ddqn_reference(x2, params)
    assert out2.shape == (batch2, action_size)
    assert jnp.allclose(out2, ref2, atol=ATOL, rtol=RTOL), "mismatch (batch=300)"

    # Large batch that exercises the multi-step parallel grid (even step count).
    batch3 = 9000
    x3 = jax.random.normal(kx3, (batch3, state_size), jnp.float32)
    out3 = jax.block_until_ready(ddqn_forward(x3, prep))
    ref3 = ddqn_reference(x3, params)
    assert out3.shape == (batch3, action_size)
    assert jnp.allclose(out3, ref3, atol=ATOL, rtol=RTOL), "mismatch (batch=9000)"

    print("KERNEL_OK")
</pallas_src>

<mosaic_0001>
module attributes {stable_mosaic.version = 11 : i64} {
  func.func @ddqn_kernel(%arg0: i32, %arg1: memref<16x128xbf16, #tpu.memory_space<vmem>>, %arg2: memref<32x16xbf16, #tpu.memory_space<vmem>>, %arg3: memref<32x1xf32, #tpu.memory_space<vmem>>, %arg4: memref<32x32xbf16, #tpu.memory_space<vmem>>, %arg5: memref<32x1xf32, #tpu.memory_space<vmem>>, %arg6: memref<4x32xbf16, #tpu.memory_space<vmem>>, %arg7: memref<4x1xf32, #tpu.memory_space<vmem>>, %arg8: memref<4x128xf32, #tpu.memory_space<vmem>>) attributes {dimension_semantics = [#tpu.dimension_semantics<parallel>], iteration_bounds = array<i64: 1>, scalar_prefetch = 0 : i64, scratch_operands = 0 : i64, tpu.core_type = #tpu.core_type<tc>, window_params = [{transform_indices = @transform_0, window_bounds = array<i64: 16, 128>}, {pipeline_mode = #tpu.pipeline_mode<synchronous>, transform_indices = @transform_1, window_bounds = array<i64: 32, 16>}, {pipeline_mode = #tpu.pipeline_mode<synchronous>, transform_indices = @transform_2, window_bounds = array<i64: 32, 1>}, {pipeline_mode = #tpu.pipeline_mode<synchronous>, transform_indices = @transform_3, window_bounds = array<i64: 32, 32>}, {pipeline_mode = #tpu.pipeline_mode<synchronous>, transform_indices = @transform_4, window_bounds = array<i64: 32, 1>}, {pipeline_mode = #tpu.pipeline_mode<synchronous>, transform_indices = @transform_5, window_bounds = array<i64: 4, 32>}, {pipeline_mode = #tpu.pipeline_mode<synchronous>, transform_indices = @transform_6, window_bounds = array<i64: 4, 1>}, {transform_indices = @transform_7, window_bounds = array<i64: 4, 128>}]} {
    %c0 = arith.constant 0 : index
    %c0_0 = arith.constant 0 : index
    %0 = vector.load %arg1[%c0, %c0_0] : memref<16x128xbf16, #tpu.memory_space<vmem>>, vector<16x128xbf16>
    %c0_1 = arith.constant 0 : index
    %c0_2 = arith.constant 0 : index
    %1 = vector.load %arg2[%c0_1, %c0_2] : memref<32x16xbf16, #tpu.memory_space<vmem>>, vector<32x16xbf16>
    %cst = arith.constant dense<0.000000e+00> : vector<32x128xf32>
    %2 = tpu.matmul %1, %0, %cst {dimension_numbers = #tpu.dot_dimension_numbers<[1], [0], [0], [1], [0, 0, 1, 1], [], []>} : vector<32x16xbf16>, vector<16x128xbf16>, vector<32x128xf32> -> vector<32x128xf32>
    %c0_3 = arith.constant 0 : index
    %c0_4 = arith.constant 0 : index
    %3 = vector.load %arg3[%c0_3, %c0_4] : memref<32x1xf32, #tpu.memory_space<vmem>>, vector<32x1xf32>
    %4 = vector.broadcast %3 : vector<32x1xf32> to vector<32x128xf32>
    %5 = arith.addf %2, %4 : vector<32x128xf32>
    %cst_5 = arith.constant 0.000000e+00 : f32
    %6 = vector.broadcast %cst_5 : f32 to vector<32x128xf32>
    %7 = arith.maximumf %5, %6 : vector<32x128xf32>
    %c0_6 = arith.constant 0 : index
    %c0_7 = arith.constant 0 : index
    %8 = vector.load %arg4[%c0_6, %c0_7] : memref<32x32xbf16, #tpu.memory_space<vmem>>, vector<32x32xbf16>
    %9 = arith.truncf %7 : vector<32x128xf32> to vector<32x128xbf16>
    %cst_8 = arith.constant dense<0.000000e+00> : vector<32x128xf32>
    %10 = tpu.matmul %8, %9, %cst_8 {dimension_numbers = #tpu.dot_dimension_numbers<[1], [0], [0], [1], [0, 0, 1, 1], [], []>} : vector<32x32xbf16>, vector<32x128xbf16>, vector<32x128xf32> -> vector<32x128xf32>
    %c0_9 = arith.constant 0 : index
    %c0_10 = arith.constant 0 : index
    %11 = vector.load %arg5[%c0_9, %c0_10] : memref<32x1xf32, #tpu.memory_space<vmem>>, vector<32x1xf32>
    %12 = vector.broadcast %11 : vector<32x1xf32> to vector<32x128xf32>
    %13 = arith.addf %10, %12 : vector<32x128xf32>
    %cst_11 = arith.constant 0.000000e+00 : f32
    %14 = vector.broadcast %cst_11 : f32 to vector<32x128xf32>
    %15 = arith.maximumf %13, %14 : vector<32x128xf32>
    %c0_12 = arith.constant 0 : index
    %c0_13 = arith.constant 0 : index
    %16 = vector.load %arg6[%c0_12, %c0_13] : memref<4x32xbf16, #tpu.memory_space<vmem>>, vector<4x32xbf16>
    %17 = arith.truncf %15 : vector<32x128xf32> to vector<32x128xbf16>
    %cst_14 = arith.constant dense<0.000000e+00> : vector<4x128xf32>
    %18 = tpu.matmul %16, %17, %cst_14 {dimension_numbers = #tpu.dot_dimension_numbers<[1], [0], [0], [1], [0, 0, 1, 1], [], []>} : vector<4x32xbf16>, vector<32x128xbf16>, vector<4x128xf32> -> vector<4x128xf32>
    %c0_15 = arith.constant 0 : index
    %c0_16 = arith.constant 0 : index
    %19 = vector.load %arg7[%c0_15, %c0_16] : memref<4x1xf32, #tpu.memory_space<vmem>>, vector<4x1xf32>
    %20 = vector.broadcast %19 : vector<4x1xf32> to vector<4x128xf32>
    %21 = arith.addf %18, %20 : vector<4x128xf32>
    %c0_17 = arith.constant 0 : index
    %c0_18 = arith.constant 0 : index
    %22 = vector.load %arg8[%c0_17, %c0_18] : memref<4x128xf32, #tpu.memory_space<vmem>>, vector<4x128xf32>
    tpu.vector_store %arg8[%c0_17, %c0_18], %21 {strides = array<i32>} : memref<4x128xf32, #tpu.memory_space<vmem>>, vector<4x128xf32>,
    return
  }
  func.func @transform_0(%arg0: i32) -> (i32, i32) {
    %c0_i32 = arith.constant 0 : i32
    %c0_i32_0 = arith.constant 0 : i32
    return %c0_i32, %arg0 : i32, i32
  }
  func.func @transform_1(%arg0: i32) -> (i32, i32) {
    %c0_i32 = arith.constant 0 : i32
    %c0_i32_0 = arith.constant 0 : i32
    %c0_i32_1 = arith.constant 0 : i32
    return %c0_i32, %c0_i32_0 : i32, i32
  }
  func.func @transform_2(%arg0: i32) -> (i32, i32) {
    %c0_i32 = arith.constant 0 : i32
    %c0_i32_0 = arith.constant 0 : i32
    %c0_i32_1 = arith.constant 0 : i32
    return %c0_i32, %c0_i32_0 : i32, i32
  }
  func.func @transform_3(%arg0: i32) -> (i32, i32) {
    %c0_i32 = arith.constant 0 : i32
    %c0_i32_0 = arith.constant 0 : i32
    %c0_i32_1 = arith.constant 0 : i32
    return %c0_i32, %c0_i32_0 : i32, i32
  }
  func.func @transform_4(%arg0: i32) -> (i32, i32) {
    %c0_i32 = arith.constant 0 : i32
    %c0_i32_0 = arith.constant 0 : i32
    %c0_i32_1 = arith.constant 0 : i32
    return %c0_i32, %c0_i32_0 : i32, i32
  }
  func.func @transform_5(%arg0: i32) -> (i32, i32) {
    %c0_i32 = arith.constant 0 : i32
    %c0_i32_0 = arith.constant 0 : i32
    %c0_i32_1 = arith.constant 0 : i32
    return %c0_i32, %c0_i32_0 : i32, i32
  }
  func.func @transform_6(%arg0: i32) -> (i32, i32) {
    %c0_i32 = arith.constant 0 : i32
    %c0_i32_0 = arith.constant 0 : i32
    %c0_i32_1 = arith.constant 0 : i32
    return %c0_i32, %c0_i32_0 : i32, i32
  }
  func.func @transform_7(%arg0: i32) -> (i32, i32) {
    %c0_i32 = arith.constant 0 : i32
    %c0_i32_0 = arith.constant 0 : i32
    return %c0_i32, %arg0 : i32, i32
  }
}

</mosaic_0001>

<bundles_post_ra>
// kernel: ddqn_forward.1
= control target key start
LH: loop header
LB: loop body
LE: loop exit
PB: predicated region body
PF: predicated region fallthrough
CT: control target
= control target key end

     0   :  { %vm73_vm0 = vcmask 130048   ;;  %v342_v1 = vmov 0   ;;  %vm173_vm1 = vcmask 261120   ;;  %v343_v33 = vmov 0.0   ;;  %s438_s0 = inlined_call_operand.vmem [shape: bf16[16,128], index: 0, kind: input, shape index: {}]   ;;  %s439_s1 = inlined_call_operand.vmem [shape: bf16[32,16], index: 1, kind: input, shape index: {}]   ;;  %s440_s2 = inlined_call_operand.vmem [shape: f32[32,1], index: 2, kind: input, shape index: {}]   ;;  %s441_s4 = inlined_call_operand.vmem [shape: f32[32,1], index: 4, kind: input, shape index: {}]   ;;  %s442_s6 = inlined_call_operand.vmem [shape: f32[4,1], index: 6, kind: input, shape index: {}]   ;;  %s443_s3 = inlined_call_operand.vmem [shape: bf16[32,32], index: 3, kind: input, shape index: {}]   ;;  %s444_s5 = inlined_call_operand.vmem [shape: bf16[4,32], index: 5, kind: input, shape index: {}]   ;;  %s445_s7 = inlined_call_operand.vmem [shape: f32[4,128], index: 7, kind: output, shape index: {}]  }
   0x1   :  { %v337_v0 = vld [vmem:[%s438_s0] sm:$0xff]   ;;  %335 = vset.pattern.permute.xlu0 %v342_v1  ;;  %336 = vset.pattern.permute.xlu1 %v342_v1  ;;  %v339_v3 = vld [vmem:[%s439_s1 + $0x8] sm:$0xff]   ;;  %v35_v5 = vld [vmem:[%s440_s2 + $0x10] sm:$0xff]  ;;  %vm344_vm2 = vmmov 0  }
   0x2   :  { %v338_v2 = vld [vmem:[%s439_s1] sm:$0xff]   ;;  %310 = vmatprep.subr.bf16.mxu0 %v337_v0  ;;  %49 = vperm.xlu1 %336, %v35_v5   ;;  %v34_v6 = vld [vmem:[%s440_s2 + $0x8] sm:$0xff]  ;;  %v36_v7 = vld [vmem:[%s440_s2 + $0x18] sm:$0xff] }
   0x3   :  { %311 = vmatpush3.bf16.msra.mxu0 %v337_v0  ;;  %312 = vmatprep.mubr.msk.bf16.mxu0 %vm73_vm0, %v338_v2  ;;  %v33_v4 = vld [vmem:[%s440_s2] sm:$0xff]  ;;  %v140_v9 = vld [vmem:[%s441_s4 + $0x8] sm:$0xff]  ;;  %v141_v10 = vld [vmem:[%s441_s4 + $0x10] sm:$0xff] }
   0x4   :  { %39 = vperm.xlu0 %335, %v33_v4   ;;  %v139_v8 = vld [vmem:[%s441_s4] sm:$0xff]  ;;  %v142_v11 = vld [vmem:[%s441_s4 + $0x18] sm:$0xff]  ;;  %v341_v32 = vld [vmem:[%s443_s3 + $0x8] sm:$0xff]   ;;  %324 = vmatprep.subr.bf16.mxu0 %v343_v33 }
   0x5   :  { %v236_v12 = vld [vmem:[%s442_s6] sm:$0xf] }
   0x6   :  { %313 = vmatmul.mubr.msk.bf16.vlgmr.msra.gmra.mrb[0].mxu0 %vm73_vm0, %v339_v3  ;;  %54 = vperm.xlu1 %336, %v36_v7   ;;  %v340_v13 = vld [vmem:[%s443_s3] sm:$0xff]  }
   0x7   :  { %320 = vmatprep.mubr.msk.bf16.mxu1 %vm173_vm1, %v340_v13  ;;  %328 = vmatprep.mubr.msk.bf16.mxu0 %vm344_vm2, %v343_v33  ;;  %v233_v52 = vld [vmem:[%s444_s5] sm:$0x3] }
   0x8   :  { %44 = vperm.xlu0 %335, %v34_v6  }
   0xa   :  { %150 = vperm.xlu1 %336, %v140_v9  }
   0xc   :  { %145 = vperm.xlu0 %335, %v139_v8  }
   0xe   :  { %160 = vperm.xlu1 %336, %v142_v11  }
  0x10   :  { %155 = vperm.xlu0 %335, %v141_v10  }
  0x14   :  { %239 = vperm.xlu0 %335, %v236_v12  }
  0x81   :  { %v50_v14 = vpop.permute.xlu1 %49 }
  0x83   :  { %v40_v15 = vpop.permute.xlu0 %39 }
  0x85   :  { %v55_v19 = vpop.permute.xlu1 %54 }
  0x87   :  { %v45_v22 = vpop.permute.xlu0 %44 }
  0x89   :  { %v151_v35 = vpop.permute.xlu1 %150 }
  0x8b   :  { %v146_v34 = vpop.permute.xlu0 %145 }
  0x8d   :  { %v161_v40 = vpop.permute.xlu1 %160 }
  0x8f   :  { %v156_v36 = vpop.permute.xlu0 %155 }
  0x93   :  { %v240_v53 = vpop.permute.xlu0 %239 }
  0xd9   :  { %v314_v16 = vpop.f32.mrb[0].mxu0 }
  0xda   :  { %v123_v17 = vadd.f32 %v314_v16, %v50_v14  ;;  %v114_v18 = vpop.f32.mrb[1].mxu0 }
  0xdb   :  { %v115_v20 = vadd.f32 %v114_v18, %v40_v15  ;;  %v315_v21 = vpop.f32.mrb[2].mxu0 }
  0xdc   :  { %v126_v23 = vadd.f32 %v315_v21, %v55_v19  ;;  %v117_v24 = vpop.f32.mrb[3].mxu0  ;;  %v131_v26 = vmax.f32 %v123_v17, 0.0 }
  0xdd   :  { %v118_v25 = vadd.f32 %v117_v24, %v45_v22  ;;  %v129_v28 = vmax.f32 %v115_v20, 0.0 }
  0xde   :  { %v132_v27 = vmax.f32 %v126_v23, 0.0 }
  0xdf   :  { %v130_v29 = vmax.f32 %v118_v25, 0.0 }
  0xe0   :  { %v138_v30 = vpack.c.bf16 %v132_v27, %v131_v26 }
  0xe1   :  { %v137_v31 = vpack.c.bf16 %v130_v29, %v129_v28 }
  0xe3   :  { %316 = vmatprep.subr.bf16.mxu1 %v137_v31 }
  0xe4   :  { %317 = vmatpush3.bf16.msra.mxu1 %v137_v31 }
  0xe5   :  { %318 = vmatprep.subr.bf16.mxu1 %v138_v30 }
  0xe8   :  { %319 = vmatpush3.bf16.msra.mxu1 %v138_v30 }
  0xeb   :  { %321 = vmatmul.mubr.msk.bf16.vlgmr.msra.gmra.mrb[0].mxu1 %vm173_vm1, %v341_v32 }
 0x1be   :  { %v322_v37 = vpop.f32.mrb[0].mxu1 }
 0x1bf   :  { %v223_v38 = vadd.f32 %v322_v37, %v156_v36  ;;  %v214_v39 = vpop.f32.mrb[1].mxu1 }
 0x1c0   :  { %v215_v41 = vadd.f32 %v214_v39, %v146_v34  ;;  %v323_v42 = vpop.f32.mrb[2].mxu1 }
 0x1c1   :  { %v226_v43 = vadd.f32 %v323_v42, %v161_v40  ;;  %v217_v44 = vpop.f32.mrb[3].mxu1  ;;  %v231_v46 = vmax.f32 %v223_v38, 0.0 }
 0x1c2   :  { %v218_v45 = vadd.f32 %v217_v44, %v151_v35  ;;  %v229_v48 = vmax.f32 %v215_v41, 0.0 }
 0x1c3   :  { %v232_v47 = vmax.f32 %v226_v43, 0.0 }
 0x1c4   :  { %v230_v49 = vmax.f32 %v218_v45, 0.0 }
 0x1c5   :  { %v235_v50 = vpack.c.bf16 %v232_v47, %v231_v46 }
 0x1c6   :  { %v234_v51 = vpack.c.bf16 %v230_v49, %v229_v48 }
 0x1c8   :  { %325 = vmatpush3.bf16.msra.mxu0 %v234_v51 }
 0x1c9   :  { %326 = vmatprep.subr.bf16.mxu0 %v343_v33 }
 0x1cc   :  { %327 = vmatpush3.bf16.msra.mxu0 %v235_v50 }
 0x1cf   :  { %329 = vmatmul.mubr.msk.bf16.vlgmr.msra.gmra.mrb[4].mxu0 %vm173_vm1, %v233_v52 }
 0x2a2   :  { %v279_v54 = vpop.f32.mrb[4].mxu0 }
 0x2a3   :  { %v280_v55 = vadd.f32 %v279_v54, %v240_v53  ;;  %v330_v56 = vpop.f32.mrb[5].mxu0 }
 0x2a4   :  { %v282_v57 = vpop.f32.mrb[6].mxu0 }
 0x2a5   :  { %285 = vst [vmem:[%s445_s7] sm:$0xf] %v280_v55  ;;  %v331_v58 = vpop.f32.mrb[7].mxu0 }

</bundles_post_ra>
